<compile_context>
chip_gen: v7x
topology: tpu7x:2x2x1
jax: 0.10.0
libtpu: 0.0.40
codegen_flags: <defaults>
</compile_context>

<pallas_src>
import functools

import jax
import jax.numpy as jnp
from jax.experimental import pallas as pl
from jax.experimental.pallas import tpu as pltpu


LAYER_SIZES = (64, 16, 256, 32)   # l0, l1, l2, l3 as in the PyTorch module


# ---------------------------------------------------------------------------
# Pallas kernel: folded BN affine + 6 small MXU dots (f32 accum) + lane reduce
# ---------------------------------------------------------------------------
def _macritic_kernel(dims, state_ref, action_ref, bn_ref, vec_ref,
                     w1s_ref, w1a_ref, w2a_ref, w2b_ref, w3a_ref, w3b_ref,
                     out_ref):
    """
    state_ref  : [B, SD]    f32, cat(this_state, other_state)
    action_ref : [B, AD]    f32, cat(this_action, other_action)
    bn_ref     : [2, SD]    f32, row0 = BN scale, row1 = BN shift (batch stats folded)
    vec_ref    : [8, 256]   f32, rows: b1 | b2a | b2b | b3 | w4 | b4 | pad | pad
    w1s_ref    : [SD, 256]  bf16, L1 state block  (halves at lanes 0-127 / 128-255)
    w1a_ref    : [AD, 256]  bf16, L1 action block
    w2a_ref    : [128, 256] bf16, fc2   (rows 80..127 zero-padded)
    w2b_ref    : [128, 256] bf16, fc2_o (rows 80..127 zero-padded)
    w3a_ref    : [256, 32]  bf16, fc3 rows for this_v
    w3b_ref    : [256, 32]  bf16, fc3 rows for other_v
    out_ref    : [B, 1]     f32
    """
    H1P, HALF, L2, H3 = dims["H1P"], dims["HALF"], dims["L2"], dims["H3"]

    vec = vec_ref[...]                       # [8, 256], one small aligned DMA
    b1 = vec[0:1, :H1P]
    b2a = vec[1:2, :L2]
    b2b = vec[2:3, :L2]
    b3 = vec[3:4, :H3]
    w4_row = vec[4:5, :H3]                   # fc4 weight as a row
    b4 = vec[5:6, 0:1]

    bn = bn_ref[...]
    scale = bn[0:1, :]
    shift = bn[1:2, :]

    # Folded BatchNorm (stats precomputed in wrapper): one per-lane affine, f32.
    s_n = state_ref[...] * scale + shift     # [B, SD]
    a = action_ref[...]                      # [B, AD]

    relu = lambda t: jnp.maximum(t, jnp.float32(0.0))
    bf = lambda t: t.astype(jnp.bfloat16)
    mm = lambda u, w: jnp.dot(u, w, preferred_element_type=jnp.float32)

    # Layer 1: state block + action block (replaces the wrapper-side concat).
    h1 = relu(mm(bf(s_n), w1s_ref[...]) + mm(bf(a), w1a_ref[...]) + b1)  # [B, 256]
    h1 = bf(h1)

    # Layer 2: two dense halves (no structural-zero DMA), 128-lane-aligned split.
    h2a = relu(mm(h1[:, :HALF], w2a_ref[...]) + b2a)     # [B, 256] = this_v
    h2b = relu(mm(h1[:, HALF:], w2b_ref[...]) + b2b)     # [B, 256] = other_v

    # Layer 3 accumulates both halves.
    h3 = relu(mm(bf(h2a), w3a_ref[...]) + mm(bf(h2b), w3b_ref[...]) + b3)  # [B, 32]

    # fc4 ([32] -> 1) as a lane reduce in f32; avoids a degenerate [32,1] MXU pass.
    out_ref[...] = jnp.sum(h3 * w4_row, axis=-1, keepdims=True) + b4


# ---------------------------------------------------------------------------
# Parameter construction (original PyTorch-layer form, deterministic init)
# ---------------------------------------------------------------------------
def init_params(key, state_size, other_states, action_size, other_actions,
                layer_sizes=LAYER_SIZES):
    l0, l1, l2, l3 = layer_sizes

    def linear(key, fan_in, fan_out):
        k1, k2 = jax.random.split(key)
        bound = 1.0 / jnp.sqrt(jnp.float32(fan_in))
        # stored already transposed: [in, out]
        w = jax.random.uniform(k1, (fan_in, fan_out), jnp.float32, -bound, bound)
        b = jax.random.uniform(k2, (fan_out,), jnp.float32, -bound, bound)
        return w, b

    keys = jax.random.split(key, 12)
    p = {}
    # BatchNorm affine params (non-default values so the test is non-trivial)
    p["bns_g"] = 1.0 + 0.1 * jax.random.normal(keys[0], (state_size,), jnp.float32)
    p["bns_b"] = 0.1 * jax.random.normal(keys[1], (state_size,), jnp.float32)
    p["bnso_g"] = 1.0 + 0.1 * jax.random.normal(keys[2], (other_states,), jnp.float32)
    p["bnso_b"] = 0.1 * jax.random.normal(keys[3], (other_states,), jnp.float32)

    p["wS"], p["bS"] = linear(keys[4], state_size, l0)
    p["wA"], p["bA"] = linear(keys[5], action_size, l1)
    p["wSo"], p["bSo"] = linear(keys[6], other_states, l0)
    p["wAo"], p["bAo"] = linear(keys[7], other_actions, l1)
    p["w2"], p["b2"] = linear(keys[8], l0 + l1, l2)
    p["w2o"], p["b2o"] = linear(keys[9], l0 + l1, l2)
    p["w3"], p["b3"] = linear(keys[10], l2 * 2, l3)
    p["w4"], p["b4"] = linear(keys[11], l3, 1)
    return p


# ---------------------------------------------------------------------------
# One-time repacking into the kernel's slab layout (done outside the kernel)
# ---------------------------------------------------------------------------
def pack_params(p, state_size, other_states, action_size, other_actions,
                layer_sizes=LAYER_SIZES):
    l0, l1, l2, l3 = layer_sizes
    SS, OS, AS, OA = state_size, other_states, action_size, other_actions
    SD = SS + OS                   # state lanes
    AD = AS + OA                   # action lanes
    HALF = 128                     # lane boundary between this/other halves of h1
    H1P = 2 * HALF                 # padded first-layer width
    L2 = l2                        # 256
    H3 = l3                        # 32
    VEC = max(H1P, L2, H3)         # 256
    assert l0 + l1 <= HALF and L2 <= VEC

    # L1 split into a state block and an action block (no wrapper concat):
    #   half 0: lanes [0:l0]           = fcState,   [l0:l0+l1]           = fcAction
    #   half 1: lanes [128:128+l0]     = fcState_o, [128+l0:128+l0+l1]   = fcAction_o
    w1s = jnp.zeros((SD, H1P), jnp.float32)
    w1s = w1s.at[0:SS, 0:l0].set(p["wS"])
    w1s = w1s.at[SS:SD, HALF:HALF + l0].set(p["wSo"])
    w1a = jnp.zeros((AD, H1P), jnp.float32)
    w1a = w1a.at[0:AS, l0:l0 + l1].set(p["wA"])
    w1a = w1a.at[AS:AD, HALF + l0:HALF + l0 + l1].set(p["wAo"])
    b1 = jnp.zeros((H1P,), jnp.float32)
    b1 = b1.at[0:l0 + l1].set(jnp.concatenate([p["bS"], p["bA"]]))
    b1 = b1.at[HALF:HALF + l0 + l1].set(jnp.concatenate([p["bSo"], p["bAo"]]))

    # L2 as two dense [128, l2] blocks (only 80 rows active; rest zero-padded,
    # but no 50%-zero [160,512] slab is DMA'd anymore).
    w2a = jnp.zeros((HALF, l2), jnp.float32).at[0:l0 + l1, :].set(p["w2"])
    w2b = jnp.zeros((HALF, l2), jnp.float32).at[0:l0 + l1, :].set(p["w2o"])

    # L3 split to match the two L2 halves.
    w3a = p["w3"][:l2, :]
    w3b = p["w3"][l2:, :]

    def row(v):
        r = jnp.zeros((VEC,), jnp.float32)
        return r.at[: v.shape[0]].set(v)

    # Bias / fc4 slab [8, 256] f32 (small, stays f32 for exact bias add).
    vec = jnp.stack([
        row(b1), row(p["b2"]), row(p["b2o"]), row(p["b3"]),
        row(p["w4"][:, 0]), row(p["b4"]),
        jnp.zeros((VEC,), jnp.float32), jnp.zeros((VEC,), jnp.float32),
    ])                                        # [8, 256]

    # BN affine params over the full state row (per-feature, so identical to
    # the two separate BatchNorm1d modules).
    gamma = jnp.concatenate([p["bns_g"], p["bnso_g"]])[None, :]   # [1, SD]
    beta = jnp.concatenate([p["bns_b"], p["bnso_b"]])[None, :]    # [1, SD]

    bf16 = jnp.bfloat16
    packed = dict(
        vec=vec, gamma=gamma, beta=beta,
        w1s=w1s.astype(bf16), w1a=w1a.astype(bf16),
        w2a=w2a.astype(bf16), w2b=w2b.astype(bf16),
        w3a=w3a.astype(bf16), w3b=w3b.astype(bf16),
    )
    dims = dict(SD=SD, AD=AD, HALF=HALF, H1P=H1P, L2=L2, H3=H3)
    return packed, dims


# ---------------------------------------------------------------------------
# Wrapper: hoist BN batch stats (tiny XLA reduce), call the Pallas kernel
# ---------------------------------------------------------------------------
def macritic_forward(state, action, packed, dims):
    B = state.shape[0]
    eps = jnp.float32(1e-5)

    # Training-mode BatchNorm statistics over the full batch, folded into one
    # per-lane affine (scale, shift) applied inside the kernel.
    mu = jnp.mean(state, axis=0, keepdims=True)
    var = jnp.mean(jnp.square(state - mu), axis=0, keepdims=True)
    scale = packed["gamma"] * jax.lax.rsqrt(var + eps)
    shift = packed["beta"] - mu * scale
    bn = jnp.concatenate([scale, shift], axis=0)          # [2, SD]

    kernel = functools.partial(_macritic_kernel, dims)
    vmem = pltpu.MemorySpace.VMEM
    return pl.pallas_call(
        kernel,
        out_shape=jax.ShapeDtypeStruct((B, 1), jnp.float32),
        # No grid: whole working set (~0.3 MiB) fits VMEM on every generation;
        # each operand is one full-block DMA.
        in_specs=[pl.BlockSpec(memory_space=vmem)] * 10,
        out_specs=pl.BlockSpec(memory_space=vmem),
    )(state, action, bn, packed["vec"],
      packed["w1s"], packed["w1a"],
      packed["w2a"], packed["w2b"],
      packed["w3a"], packed["w3b"])


# ---------------------------------------------------------------------------
# Pure-JAX reference (original, unpacked module structure, f32) for verification
# ---------------------------------------------------------------------------
def macritic_reference(state, action, p, state_size, action_size):
    eps = 1e-5
    this_s = state[:, :state_size]
    other_s = state[:, state_size:]
    this_a = action[:, :action_size]
    other_a = action[:, action_size:]

    def bn(x, g, b):
        mu = jnp.mean(x, axis=0, keepdims=True)
        var = jnp.mean((x - mu) ** 2, axis=0, keepdims=True)
        return (x - mu) / jnp.sqrt(var + eps) * g + b

    relu = lambda t: jnp.maximum(t, 0.0)
    this_s = bn(this_s, p["bns_g"], p["bns_b"])
    other_s = bn(other_s, p["bnso_g"], p["bnso_b"])
    h_s = relu(this_s @ p["wS"] + p["bS"])
    h_a = relu(this_a @ p["wA"] + p["bA"])
    h_so = relu(other_s @ p["wSo"] + p["bSo"])
    h_ao = relu(other_a @ p["wAo"] + p["bAo"])
    this_v = relu(jnp.concatenate([h_s, h_a], 1) @ p["w2"] + p["b2"])
    other_v = relu(jnp.concatenate([h_so, h_ao], 1) @ p["w2o"] + p["b2o"])
    v = relu(jnp.concatenate([this_v, other_v], 1) @ p["w3"] + p["b3"])
    return v @ p["w4"] + p["b4"]


if __name__ == "__main__":
    # Small shapes consistent with the module's forward:
    # state = [B, state_size + other_states], action = [B, action_size + other_actions]
    B = 8
    state_size, other_states = 12, 12
    action_size, other_actions = 4, 4

    key = jax.random.PRNGKey(0)
    k_param, k_state, k_action = jax.random.split(key, 3)

    params = init_params(k_param, state_size, other_states, action_size, other_actions)
    packed, dims = pack_params(params, state_size, other_states, action_size, other_actions)

    state = jax.random.normal(k_state, (B, state_size + other_states), jnp.float32)
    action = jax.random.normal(k_action, (B, action_size + other_actions), jnp.float32)

    q = macritic_forward(state, action, packed, dims)
    q = jax.block_until_ready(q)

    q_ref = macritic_reference(state, action, params, state_size, action_size)
    assert q.shape == (B, 1)
    # bf16 weights in the MXU path -> looser tolerance vs the f32 reference.
    assert jnp.allclose(q, q_ref, atol=3e-2, rtol=3e-2), (q, q_ref)

    print("KERNEL_OK")
</pallas_src>

<mosaic_0001>
module attributes {stable_mosaic.version = 11 : i64} {
  func.func @_macritic_kernel(%arg0: memref<8x24xf32, #tpu.memory_space<vmem>>, %arg1: memref<8x8xf32, #tpu.memory_space<vmem>>, %arg2: memref<2x24xf32, #tpu.memory_space<vmem>>, %arg3: memref<8x256xf32, #tpu.memory_space<vmem>>, %arg4: memref<24x256xbf16, #tpu.memory_space<vmem>>, %arg5: memref<8x256xbf16, #tpu.memory_space<vmem>>, %arg6: memref<128x256xbf16, #tpu.memory_space<vmem>>, %arg7: memref<128x256xbf16, #tpu.memory_space<vmem>>, %arg8: memref<256x32xbf16, #tpu.memory_space<vmem>>, %arg9: memref<256x32xbf16, #tpu.memory_space<vmem>>, %arg10: memref<8x1xf32, #tpu.memory_space<vmem>>) attributes {dimension_semantics = [], scalar_prefetch = 0 : i64, scratch_operands = 0 : i64, tpu.core_type = #tpu.core_type<tc>} {
    %c0 = arith.constant 0 : index
    %c0_0 = arith.constant 0 : index
    %0 = vector.load %arg3[%c0, %c0_0] : memref<8x256xf32, #tpu.memory_space<vmem>>, vector<8x256xf32>
    %1 = vector.extract_strided_slice %0 {offsets = [0, 0], sizes = [1, 256], strides = [1, 1]} : vector<8x256xf32> to vector<1x256xf32>
    %2 = vector.extract_strided_slice %0 {offsets = [1, 0], sizes = [1, 256], strides = [1, 1]} : vector<8x256xf32> to vector<1x256xf32>
    %3 = vector.extract_strided_slice %0 {offsets = [2, 0], sizes = [1, 256], strides = [1, 1]} : vector<8x256xf32> to vector<1x256xf32>
    %4 = vector.extract_strided_slice %0 {offsets = [3, 0], sizes = [1, 32], strides = [1, 1]} : vector<8x256xf32> to vector<1x32xf32>
    %5 = vector.extract_strided_slice %0 {offsets = [4, 0], sizes = [1, 32], strides = [1, 1]} : vector<8x256xf32> to vector<1x32xf32>
    %6 = vector.extract_strided_slice %0 {offsets = [5, 0], sizes = [1, 1], strides = [1, 1]} : vector<8x256xf32> to vector<1x1xf32>
    %c0_1 = arith.constant 0 : index
    %c0_2 = arith.constant 0 : index
    %7 = vector.load %arg2[%c0_1, %c0_2] : memref<2x24xf32, #tpu.memory_space<vmem>>, vector<2x24xf32>
    %8 = vector.extract_strided_slice %7 {offsets = [0, 0], sizes = [1, 24], strides = [1, 1]} : vector<2x24xf32> to vector<1x24xf32>
    %9 = vector.extract_strided_slice %7 {offsets = [1, 0], sizes = [1, 24], strides = [1, 1]} : vector<2x24xf32> to vector<1x24xf32>
    %c0_3 = arith.constant 0 : index
    %c0_4 = arith.constant 0 : index
    %10 = vector.load %arg0[%c0_3, %c0_4] : memref<8x24xf32, #tpu.memory_space<vmem>>, vector<8x24xf32>
    %11 = vector.broadcast %8 : vector<1x24xf32> to vector<8x24xf32>
    %12 = arith.mulf %10, %11 : vector<8x24xf32>
    %13 = vector.broadcast %9 : vector<1x24xf32> to vector<8x24xf32>
    %14 = arith.addf %12, %13 : vector<8x24xf32>
    %c0_5 = arith.constant 0 : index
    %c0_6 = arith.constant 0 : index
    %15 = vector.load %arg1[%c0_5, %c0_6] : memref<8x8xf32, #tpu.memory_space<vmem>>, vector<8x8xf32>
    %16 = arith.truncf %14 : vector<8x24xf32> to vector<8x24xbf16>
    %c0_7 = arith.constant 0 : index
    %c0_8 = arith.constant 0 : index
    %17 = vector.load %arg4[%c0_7, %c0_8] : memref<24x256xbf16, #tpu.memory_space<vmem>>, vector<24x256xbf16>
    %cst = arith.constant dense<0.000000e+00> : vector<8x256xf32>
    %18 = tpu.matmul %16, %17, %cst {dimension_numbers = #tpu.dot_dimension_numbers<[1], [0], [0], [1], [0, 0, 1, 1], [], []>} : vector<8x24xbf16>, vector<24x256xbf16>, vector<8x256xf32> -> vector<8x256xf32>
    %19 = arith.truncf %15 : vector<8x8xf32> to vector<8x8xbf16>
    %c0_9 = arith.constant 0 : index
    %c0_10 = arith.constant 0 : index
    %20 = vector.load %arg5[%c0_9, %c0_10] : memref<8x256xbf16, #tpu.memory_space<vmem>>, vector<8x256xbf16>
    %cst_11 = arith.constant dense<0.000000e+00> : vector<8x256xf32>
    %21 = tpu.matmul %19, %20, %cst_11 {dimension_numbers = #tpu.dot_dimension_numbers<[1], [0], [0], [1], [0, 0, 1, 1], [], []>} : vector<8x8xbf16>, vector<8x256xbf16>, vector<8x256xf32> -> vector<8x256xf32>
    %22 = arith.addf %18, %21 : vector<8x256xf32>
    %23 = vector.broadcast %1 : vector<1x256xf32> to vector<8x256xf32>
    %24 = arith.addf %22, %23 : vector<8x256xf32>
    %cst_12 = arith.constant 0.000000e+00 : f32
    %25 = vector.broadcast %cst_12 : f32 to vector<8x256xf32>
    %26 = arith.maximumf %24, %25 : vector<8x256xf32>
    %27 = arith.truncf %26 : vector<8x256xf32> to vector<8x256xbf16>
    %28 = vector.extract_strided_slice %27 {offsets = [0, 0], sizes = [8, 128], strides = [1, 1]} : vector<8x256xbf16> to vector<8x128xbf16>
    %c0_13 = arith.constant 0 : index
    %c0_14 = arith.constant 0 : index
    %29 = vector.load %arg6[%c0_13, %c0_14] : memref<128x256xbf16, #tpu.memory_space<vmem>>, vector<128x256xbf16>
    %cst_15 = arith.constant dense<0.000000e+00> : vector<8x256xf32>
    %30 = tpu.matmul %28, %29, %cst_15 {dimension_numbers = #tpu.dot_dimension_numbers<[1], [0], [0], [1], [0, 0, 1, 1], [], []>} : vector<8x128xbf16>, vector<128x256xbf16>, vector<8x256xf32> -> vector<8x256xf32>
    %31 = vector.broadcast %2 : vector<1x256xf32> to vector<8x256xf32>
    %32 = arith.addf %30, %31 : vector<8x256xf32>
    %cst_16 = arith.constant 0.000000e+00 : f32
    %33 = vector.broadcast %cst_16 : f32 to vector<8x256xf32>
    %34 = arith.maximumf %32, %33 : vector<8x256xf32>
    %35 = vector.extract_strided_slice %27 {offsets = [0, 128], sizes = [8, 128], strides = [1, 1]} : vector<8x256xbf16> to vector<8x128xbf16>
    %c0_17 = arith.constant 0 : index
    %c0_18 = arith.constant 0 : index
    %36 = vector.load %arg7[%c0_17, %c0_18] : memref<128x256xbf16, #tpu.memory_space<vmem>>, vector<128x256xbf16>
    %cst_19 = arith.constant dense<0.000000e+00> : vector<8x256xf32>
    %37 = tpu.matmul %35, %36, %cst_19 {dimension_numbers = #tpu.dot_dimension_numbers<[1], [0], [0], [1], [0, 0, 1, 1], [], []>} : vector<8x128xbf16>, vector<128x256xbf16>, vector<8x256xf32> -> vector<8x256xf32>
    %38 = vector.broadcast %3 : vector<1x256xf32> to vector<8x256xf32>
    %39 = arith.addf %37, %38 : vector<8x256xf32>
    %cst_20 = arith.constant 0.000000e+00 : f32
    %40 = vector.broadcast %cst_20 : f32 to vector<8x256xf32>
    %41 = arith.maximumf %39, %40 : vector<8x256xf32>
    %42 = arith.truncf %34 : vector<8x256xf32> to vector<8x256xbf16>
    %c0_21 = arith.constant 0 : index
    %c0_22 = arith.constant 0 : index
    %43 = vector.load %arg8[%c0_21, %c0_22] : memref<256x32xbf16, #tpu.memory_space<vmem>>, vector<256x32xbf16>
    %cst_23 = arith.constant dense<0.000000e+00> : vector<8x32xf32>
    %44 = tpu.matmul %42, %43, %cst_23 {dimension_numbers = #tpu.dot_dimension_numbers<[1], [0], [0], [1], [0, 0, 1, 1], [], []>} : vector<8x256xbf16>, vector<256x32xbf16>, vector<8x32xf32> -> vector<8x32xf32>
    %45 = arith.truncf %41 : vector<8x256xf32> to vector<8x256xbf16>
    %c0_24 = arith.constant 0 : index
    %c0_25 = arith.constant 0 : index
    %46 = vector.load %arg9[%c0_24, %c0_25] : memref<256x32xbf16, #tpu.memory_space<vmem>>, vector<256x32xbf16>
    %cst_26 = arith.constant dense<0.000000e+00> : vector<8x32xf32>
    %47 = tpu.matmul %45, %46, %cst_26 {dimension_numbers = #tpu.dot_dimension_numbers<[1], [0], [0], [1], [0, 0, 1, 1], [], []>} : vector<8x256xbf16>, vector<256x32xbf16>, vector<8x32xf32> -> vector<8x32xf32>
    %48 = arith.addf %44, %47 : vector<8x32xf32>
    %49 = vector.broadcast %4 : vector<1x32xf32> to vector<8x32xf32>
    %50 = arith.addf %48, %49 : vector<8x32xf32>
    %cst_27 = arith.constant 0.000000e+00 : f32
    %51 = vector.broadcast %cst_27 : f32 to vector<8x32xf32>
    %52 = arith.maximumf %50, %51 : vector<8x32xf32>
    %53 = vector.broadcast %5 : vector<1x32xf32> to vector<8x32xf32>
    %54 = arith.mulf %52, %53 : vector<8x32xf32>
    %cst_28 = arith.constant dense<0.000000e+00> : vector<8xf32>
    %55 = vector.multi_reduction <add>, %54, %cst_28 [1] : vector<8x32xf32> to vector<8xf32>
    %56 = vector.shape_cast %55 : vector<8xf32> to vector<8x1xf32>
    %57 = vector.broadcast %6 : vector<1x1xf32> to vector<8x1xf32>
    %58 = arith.addf %56, %57 : vector<8x1xf32>
    %c0_29 = arith.constant 0 : index
    %c0_30 = arith.constant 0 : index
    %59 = vector.load %arg10[%c0_29, %c0_30] : memref<8x1xf32, #tpu.memory_space<vmem>>, vector<8x1xf32>
    tpu.vector_store %arg10[%c0_29, %c0_30], %58 {strides = array<i32>} : memref<8x1xf32, #tpu.memory_space<vmem>>, vector<8x1xf32>,
    return
  }
}

</mosaic_0001>

<bundles_post_ra>
// kernel: tpu_custom_call.1
= control target key start
LH: loop header
LB: loop body
LE: loop exit
PB: predicated region body
PF: predicated region fallthrough
CT: control target
= control target key end

     0   :  { %15 = vsyncpa [#allocation3], 0  ;;  %s1469_s0 = inlined_call_operand.hbm [shape: f32[8,24], index: 0, kind: input, shape index: {}]   ;;  %s1470_s1 = inlined_call_operand.hbm [shape: f32[8,8], index: 1, kind: input, shape index: {}]   ;;  %s1471_s2 = inlined_call_operand.vmem [shape: f32[2,24], index: 2, kind: input, shape index: {}]   ;;  %s1472_s3 = inlined_call_operand.vmem [shape: f32[8,256], index: 3, kind: input, shape index: {}]   ;;  %s1473_s4 = inlined_call_operand.vmem [shape: bf16[24,256], index: 4, kind: input, shape index: {}]   ;;  %s1474_s5 = inlined_call_operand.vmem [shape: bf16[8,256], index: 5, kind: input, shape index: {}]   ;;  %s1475_s6 = inlined_call_operand.vmem [shape: bf16[128,256], index: 6, kind: input, shape index: {}]   ;;  %s1476_s7 = inlined_call_operand.vmem [shape: bf16[128,256], index: 7, kind: input, shape index: {}]   ;;  %s1477_s8 = inlined_call_operand.vmem [shape: bf16[256,32], index: 8, kind: input, shape index: {}]   ;;  %s1478_s9 = inlined_call_operand.vmem [shape: bf16[256,32], index: 9, kind: input, shape index: {}]   ;;  %s1479_s10 = inlined_call_operand.vmem [shape: f32[8,1], index: 10, kind: output, shape index: {}]  }
   0x1   :  { %16 = vsyncpa [#allocation5], 0  ;;  %s1136_s13 = smov [#allocation2]   ;;  %s1137_s15 = smov [#allocation4]  }
   0x2   :  { %s23_s14 = sshll.u32 %s1136_s13, 4  ;;  %s33_s16 = sshll.u32 %s1137_s15, 4  ;;  %s24_s14 = int_to_ptr.vmem [resolvable:$true] %s23_s14  ;;  %s34_s16 = int_to_ptr.vmem [resolvable:$true] %s33_s16 }
   0x3   :  { %s1088_s19 = scalar_lea.hbm %s1469_s0, 128 }
   0x4   :  { %p1089_p0 = scmp.ne.s32.totalorder %s1469_s0, %s1088_s19  ;;  %p1092_p1 = scmp.lt.u32.totalorder %s1088_s19, %s1469_s0 }
   0x6   :  { %p1094_p2 = pnand %p1092_p1, %p1089_p0 }
   0x8   :  { %1097 = shalt.err (!%p1094_p2)
}
   0x9   :  { %s1098_s24 = scalar_lea.vmem %s24_s14, 128  ;;  %p1103_p4 = scmp.lt.s32.totalorder %s24_s14, %s24_s14 }
   0xa   :  { %p1099_p3 = scmp.ne.s32.totalorder %s24_s14, %s1098_s24  ;;  %p1104_p5 = scmp.lt.s32.totalorder %s1098_s24, %s1098_s24 }
   0xc   :  { %p1105_p6 = por %p1104_p5, %p1103_p4 }
   0xe   :  { %p1106_p7 = pnand %p1105_p6, %p1099_p3 }
  0x10   :  { %1109 = shalt.err (!%p1106_p7)
}
  0x11   :  { %26 = dma.hbm_to_vmem [thread:$0]  %s1469_s0, 128, %s24_s14, [#allocation3]  }
  0x12   :  { %s1110_s29 = scalar_lea.hbm %s1470_s1, 128 }
  0x13   :  { %p1111_p8 = scmp.ne.s32.totalorder %s1470_s1, %s1110_s29  ;;  %p1114_p9 = scmp.lt.u32.totalorder %s1110_s29, %s1470_s1 }
  0x15   :  { %p1116_p10 = pnand %p1114_p9, %p1111_p8 }
  0x17   :  { %1119 = shalt.err (!%p1116_p10)
}
  0x18   :  { %s1120_s15 = scalar_lea.vmem %s34_s16, 128  ;;  %p1125_p12 = scmp.lt.s32.totalorder %s34_s16, %s34_s16 }
  0x19   :  { %p1121_p11 = scmp.ne.s32.totalorder %s34_s16, %s1120_s15  ;;  %p1126_p13 = scmp.lt.s32.totalorder %s1120_s15, %s1120_s15 }
  0x1b   :  { %p1127_p0 = por %p1126_p13, %p1125_p12 }
  0x1d   :  { %p1128_p1 = pnand %p1127_p0, %p1121_p11 }
  0x1f   :  { %1131 = shalt.err (!%p1128_p1)
}
  0x20   :  { %36 = dma.hbm_to_vmem [thread:$0]  %s1470_s1, 128, %s34_s16, [#allocation5]  }
  0x21   :  { %1132 = dma.done.wait [#allocation3], 128  }
  0x22   :  { %1133 = vsyncadd [#allocation3], 4294967168 }
  0x23   :  { %1134 = dma.done.wait [#allocation5], 128  }
  0x24   :  { %1135 = vsyncadd [#allocation5], 4294967168  ;;  %v64_v0 = vlaneseq  ;;  %v1138_v1 = vmov 0   ;;  %v1001_v5 = vld [vmem:[%s1473_s4 + $0x4] ss:$8 sps:$4 sm:$0xff]   ;;  %vm90_vm0 = vcmask 1043456  }
  0x25   :  { %129 = vmatprep.mubr.bf16.mxu0 %v1138_v1  ;;  %195 = vmatprep.mubr.bf16.mxu1 %v1138_v1  ;;  %v80_v6 = vld [vmem:[%s1474_s5] sm:$0xff]  ;;  %v78_v8 = vld [vmem:[%s1473_s4 + $0x10] sm:$0xff]  ;;  %v74_v12 = vld [vmem:[#allocation4] sm:$0xff]  ;;  %vm86_vm1 = vcmask 64512   ;;  %vm153_vm2 = vcmask 195584   ;;  %vm863_vm3 = vcmask 261120  }
  0x26   :  { %v1218_v2 = vshrl.u32 %v64_v0, 7  ;;  %v1004_v7 = vld [vmem:[%s1473_s4] ss:$8 sps:$4 sm:$0xff]   ;;  %163 = vmatprep.subr.bf16.mxu1 %v1001_v5  ;;  %v881_v9 = vcombine.high %v80_v6, %v80_v6  ;;  %v880_v10 = vcombine.low %v80_v6, %v80_v6  ;;  %v887_v11 = vcombine.high %v78_v8, %v78_v8  ;;  %v1010_v21 = vld [vmem:[%s1475_s6 + $0x4] ss:$8 sps:$4 sm:$0xff]  }
  0x27   :  { %v886_v13 = vcombine.low %v78_v8, %v78_v8  ;;  %v62_v14 = vld [vmem:[%s1471_s2] sm:$0x3]  ;;  %164 = vmatpush1.bf16.msra.mxu1 %v1004_v7  ;;  %v79_v19 = vpack.c.bf16 %v74_v12, %v74_v12  ;;  %v1013_v24 = vld [vmem:[%s1476_s7 + $0x4] ss:$8 sps:$4 sm:$0xff]   ;;  %v1016_v25 = vld [vmem:[%s1475_s6 + $0x14] ss:$8 sps:$4 sm:$0xff]  }
  0x28   :  { %v1221_v3 = vsub.s32 0, %v1218_v2  ;;  %v1224_v4 = vsub.s32 1, %v1218_v2  ;;  %v63_v15 = vld [vmem:[#allocation2] sm:$0xff]  ;;  %882 = vmatprep.subr.msk.bf16.mxu0 %vm90_vm0, %v881_v9  ;;  %v92_v18 = vsel %vm90_vm0, %v880_v10, 0  ;;  %888 = vmatprep.subr.msk.bf16.mxu1 %vm90_vm0, %v887_v11  ;;  %v1014_v29 = vld [vmem:[%s1475_s6 + $0x10] ss:$8 sps:$4 sm:$0xff]  }
  0x29   :  { %v158_v20 = vsel %vm90_vm0, %v886_v13, 0  ;;  %98 = vmatpush1.bf16.msra.mxu0 %v92_v18  ;;  %v1008_v23 = vld [vmem:[%s1475_s6] ss:$8 sps:$4 sm:$0xff]   ;;  %v1019_v30 = vld [vmem:[%s1476_s7 + $0x14] ss:$8 sps:$4 sm:$0xff]   ;;  %vm872_vm4 = vcmask 7168  }
  0x2a   :  { %v67_v16 = vrot.slane %v62_v14, %v1221_v3  ;;  %v72_v17 = vrot.slane %v62_v14, %v1224_v4  ;;  %322 = vmatprep.subr.bf16.mxu0 %v1010_v21  ;;  %v1011_v27 = vld [vmem:[%s1476_s7] ss:$8 sps:$4 sm:$0xff]   ;;  %v1022_v31 = vld [vmem:[%s1475_s6 + $0x24] ss:$8 sps:$4 sm:$0xff]   ;;  %v1017_v32 = vld [vmem:[%s1476_s7 + $0x10] ss:$8 sps:$4 sm:$0xff]  }
  0x2b   :  { %166 = vmatpush1.bf16.msra.mxu1 %v158_v20  ;;  %v1020_v33 = vld [vmem:[%s1475_s6 + $0x20] ss:$8 sps:$4 sm:$0xff]   ;;  %v1025_v34 = vld [vmem:[%s1476_s7 + $0x24] ss:$8 sps:$4 sm:$0xff]   ;;  %v1028_v36 = vld [vmem:[%s1475_s6 + $0x34] ss:$8 sps:$4 sm:$0xff]  }
  0x2c   :  { %v68_v22 = vmul.f32 %v67_v16, %v63_v15  ;;  %883 = vmatmul.mubr.msk.bf16.vlgmr.msra.gmra.mrb[0].mxu0 %vm86_vm1, %v79_v19  ;;  %469 = vmatprep.subr.bf16.mxu1 %v1013_v24  ;;  %v1023_v35 = vld [vmem:[%s1476_s7 + $0x20] ss:$8 sps:$4 sm:$0xff]   ;;  %v1026_v37 = vld [vmem:[%s1475_s6 + $0x30] ss:$8 sps:$4 sm:$0xff]   ;;  %v1031_v38 = vld [vmem:[%s1476_s7 + $0x34] ss:$8 sps:$4 sm:$0xff]  }
  0x2d   :  { %323 = vmatpush1.bf16.msra.mxu0 %v1008_v23  ;;  %354 = vmatprep.mubr.bf16.mxu0 %v1138_v1  ;;  %v1034_v39 = vld [vmem:[%s1475_s6 + $0x44] ss:$8 sps:$4 sm:$0xff]   ;;  %v1029_v40 = vld [vmem:[%s1476_s7 + $0x30] ss:$8 sps:$4 sm:$0xff]   ;;  %v1032_v41 = vld [vmem:[%s1475_s6 + $0x40] ss:$8 sps:$4 sm:$0xff]  }
  0x2e   :  { %v73_v26 = vadd.f32 %v72_v17, %v68_v22  ;;  %324 = vmatprep.subr.bf16.mxu0 %v1016_v25  ;;  %v1037_v42 = vld [vmem:[%s1476_s7 + $0x44] ss:$8 sps:$4 sm:$0xff]   ;;  %v1035_v43 = vld [vmem:[%s1476_s7 + $0x40] ss:$8 sps:$4 sm:$0xff]   ;;  %v1040_v44 = vld [vmem:[%s1475_s6 + $0x54] ss:$8 sps:$4 sm:$0xff]  }
  0x2f   :  { %v1038_v45 = vld [vmem:[%s1475_s6 + $0x50] ss:$8 sps:$4 sm:$0xff]   ;;  %v1043_v46 = vld [vmem:[%s1476_s7 + $0x54] ss:$8 sps:$4 sm:$0xff]   ;;  %v1046_v48 = vld [vmem:[%s1475_s6 + $0x64] ss:$8 sps:$4 sm:$0xff]  }
  0x30   :  { %v75_v28 = vpack.c.bf16 %v73_v26, %v73_v26  ;;  %v1041_v47 = vld [vmem:[%s1476_s7 + $0x50] ss:$8 sps:$4 sm:$0xff]   ;;  %v1044_v49 = vld [vmem:[%s1475_s6 + $0x60] ss:$8 sps:$4 sm:$0xff]   ;;  %v1049_v50 = vld [vmem:[%s1476_s7 + $0x64] ss:$8 sps:$4 sm:$0xff]  }
  0x31   :  { %325 = vmatpush1.bf16.msra.mxu0 %v1014_v29  ;;  %v1047_v51 = vld [vmem:[%s1476_s7 + $0x60] ss:$8 sps:$4 sm:$0xff]   ;;  %v1052_v52 = vld [vmem:[%s1475_s6 + $0x74] ss:$8 sps:$4 sm:$0xff]   ;;  %v1050_v53 = vld [vmem:[%s1475_s6 + $0x70] ss:$8 sps:$4 sm:$0xff]  }
  0x32   :  { %889 = vmatmul.mubr.msk.bf16.vlgmr.msra.gmra.mrb[0].mxu1 %vm153_vm2, %v75_v28  ;;  %326 = vmatprep.subr.bf16.mxu0 %v1022_v31  ;;  %v1055_v54 = vld [vmem:[%s1476_s7 + $0x74] ss:$8 sps:$4 sm:$0xff]   ;;  %v1053_v55 = vld [vmem:[%s1476_s7 + $0x70] ss:$8 sps:$4 sm:$0xff]   ;;  %v1056_v56 = vld [vmem:[%s1477_s8 + $0x40] sm:$0xff]  }
  0x33   :  { %470 = vmatpush1.bf16.msra.mxu1 %v1011_v27  ;;  %501 = vmatprep.mubr.bf16.mxu1 %v1138_v1  ;;  %v1057_v57 = vld [vmem:[%s1478_s9 + $0x40] sm:$0xff]   ;;  %v1357_v60 = vld [vmem:[%s1472_s3 + $0x8] sm:$0xff]  ;;  %v1065_v22 = vld [vmem:[%s1478_s9 + $0x50] sm:$0xff]  }
  0x34   :  { %471 = vmatprep.subr.bf16.mxu1 %v1019_v30  ;;  %v1352_v58 = vld [vmem:[%s1472_s3] sm:$0xff]  ;;  %v211_v5 = vrot.slane %v1357_v60, %v1221_v3  ;;  %v1060_v19 = vld [vmem:[%s1477_s8 + $0x48] sm:$0xff]   ;;  %v1064_v23 = vld [vmem:[%s1477_s8 + $0x50] sm:$0xff]  }
  0x35   :  { %327 = vmatpush1.bf16.msra.mxu0 %v1020_v33  ;;  %v207_v63 = vrot.slane %v1352_v58, %v1221_v3  ;;  %v1059_v15 = vld [vmem:[%s1478_s9] sm:$0xff]   ;;  %v1061_v3 = vld [vmem:[%s1478_s9 + $0x48] sm:$0xff]   ;;  %v1067_v24 = vld [vmem:[%s1478_s9 + $0x10] sm:$0xff]  }
  0x36   :  { %328 = vmatprep.subr.bf16.mxu0 %v1028_v36  ;;  %v1058_v17 = vld [vmem:[%s1477_s8] sm:$0xff]   ;;  %v1063_v20 = vld [vmem:[%s1478_s9 + $0x8] sm:$0xff]   ;;  %v1066_v25 = vld [vmem:[%s1477_s8 + $0x10] sm:$0xff]  }
  0x37   :  { %472 = vmatpush1.bf16.msra.mxu1 %v1017_v32  ;;  %v1062_v21 = vld [vmem:[%s1477_s8 + $0x8] sm:$0xff]   ;;  %v1069_v26 = vld [vmem:[%s1478_s9 + $0x58] sm:$0xff]   ;;  %v1073_v30 = vld [vmem:[%s1478_s9 + $0x60] sm:$0xff]  }
  0x38   :  { %473 = vmatprep.subr.bf16.mxu1 %v1025_v34  ;;  %v1068_v27 = vld [vmem:[%s1477_s8 + $0x58] sm:$0xff]   ;;  %v1072_v31 = vld [vmem:[%s1477_s8 + $0x60] sm:$0xff]   ;;  %v1077_v34 = vld [vmem:[%s1478_s9 + $0x68] sm:$0xff]  }
  0x39   :  { %329 = vmatpush1.bf16.msra.mxu0 %v1026_v37  ;;  %v1071_v28 = vld [vmem:[%s1478_s9 + $0x18] sm:$0xff]   ;;  %v1075_v32 = vld [vmem:[%s1478_s9 + $0x20] sm:$0xff]   ;;  %v1079_v36 = vld [vmem:[%s1478_s9 + $0x28] sm:$0xff]  }
  0x3a   :  { %330 = vmatprep.subr.bf16.mxu0 %v1034_v39  ;;  %v1070_v29 = vld [vmem:[%s1477_s8 + $0x18] sm:$0xff]   ;;  %v1074_v33 = vld [vmem:[%s1477_s8 + $0x20] sm:$0xff]   ;;  %v1078_v37 = vld [vmem:[%s1477_s8 + $0x28] sm:$0xff]  }
  0x3b   :  { %474 = vmatpush1.bf16.msra.mxu1 %v1023_v35  ;;  %v1076_v35 = vld [vmem:[%s1477_s8 + $0x68] sm:$0xff]   ;;  %v1081_v39 = vld [vmem:[%s1478_s9 + $0x70] sm:$0xff]  }
  0x3c   :  { %475 = vmatprep.subr.bf16.mxu1 %v1031_v38  ;;  %v1080_v38 = vld [vmem:[%s1477_s8 + $0x70] sm:$0xff]  }
  0x3d   :  { %331 = vmatpush1.bf16.msra.mxu0 %v1032_v41  ;;  %v1083_v41 = vld [vmem:[%s1478_s9 + $0x30] sm:$0xff]  }
  0x3e   :  { %332 = vmatprep.subr.bf16.mxu0 %v1040_v44  ;;  %v1086_v44 = vld [vmem:[%s1477_s8 + $0x38] sm:$0xff]  }
  0x3f   :  { %476 = vmatpush1.bf16.msra.mxu1 %v1029_v40  ;;  %v1082_v40 = vld [vmem:[%s1477_s8 + $0x30] sm:$0xff]  }
  0x40   :  { %477 = vmatprep.subr.bf16.mxu1 %v1037_v42  ;;  %v1084_v42 = vld [vmem:[%s1477_s8 + $0x78] sm:$0xff]  }
  0x41   :  { %333 = vmatpush1.bf16.msra.mxu0 %v1038_v45  ;;  %v1087_v45 = vld [vmem:[%s1478_s9 + $0x38] sm:$0xff]  }
  0x42   :  { %334 = vmatprep.subr.bf16.mxu0 %v1046_v48  ;;  %v241_v48 = vrot.slane %v1357_v60, %v1224_v4 }
  0x43   :  { %478 = vmatpush1.bf16.msra.mxu1 %v1035_v43  ;;  %v1085_v43 = vld [vmem:[%s1478_s9 + $0x78] sm:$0xff]  }
  0x44   :  { %479 = vmatprep.subr.bf16.mxu1 %v1043_v46  ;;  %v383_v46 = vsub.s32 2, %v1218_v2 }
  0x45   :  { %335 = vmatpush1.bf16.msra.mxu0 %v1044_v49 }
  0x46   :  { %336 = vmatprep.subr.bf16.mxu0 %v1052_v52  ;;  %v384_v49 = vrot.slane %v1352_v58, %v383_v46 }
  0x47   :  { %480 = vmatpush1.bf16.msra.mxu1 %v1041_v47  ;;  %v237_v47 = vrot.slane %v1352_v58, %v1224_v4 }
  0x48   :  { %481 = vmatprep.subr.bf16.mxu1 %v1049_v50  ;;  %v388_v50 = vrot.slane %v1357_v60, %v383_v46 }
  0x49   :  { %337 = vmatpush1.bf16.msra.mxu0 %v1050_v53 }
  0x4a   :  { %954 = vmatprep.subr.bf16.mxu0 %v1057_v57 }
  0x4b   :  { %482 = vmatpush1.bf16.msra.mxu1 %v1047_v51 }
  0x4c   :  { %483 = vmatprep.subr.bf16.mxu1 %v1055_v54 }
  0x4f   :  { %484 = vmatpush1.bf16.msra.mxu1 %v1053_v55 }
  0x50   :  { %976 = vmatprep.subr.bf16.mxu1 %v1056_v56 }
  0xff   :  { %v131_v59 = vpop.f32.mrb[0].mxu0 }
 0x100   :  { %v133_v61 = vpop.f32.mrb[1].mxu0 }
 0x101   :  { %v135_v62 = vpop.f32.mrb[2].mxu0 }
 0x102   :  { %v136_v0 = vpop.f32.mrb[3].mxu0 }
 0x105   :  { %v197_v1 = vpop.f32.mrb[0].mxu1 }
 0x106   :  { %v198_v6 = vadd.f32 %v197_v1, %v131_v59  ;;  %v199_v7 = vpop.f32.mrb[1].mxu1 }
 0x107   :  { %v200_v8 = vadd.f32 %v199_v7, %v133_v61  ;;  %v201_v9 = vpop.f32.mrb[2].mxu1 }
 0x108   :  { %v212_v10 = vadd.f32 %v207_v63, %v198_v6  ;;  %v202_v11 = vpop.f32.mrb[3].mxu1 }
 0x109   :  { %v213_v12 = vadd.f32 %v211_v5, %v200_v8 }
 0x10a   :  { %v214_v13 = vmax.f32 %v212_v10, 0.0  ;;  %v854_v10 = vsub.s32 3, %v1218_v2 }
 0x10b   :  { %v215_v14 = vmax.f32 %v213_v12, 0.0 }
 0x10c   :  { %v216_v16 = vpack.c.bf16 %v214_v13, %v214_v13 }
 0x10d   :  { %v217_v18 = vpack.c.bf16 %v215_v14, %v215_v14 }
 0x10e   :  { %355 = vmatmul.mubr.bf16.vlgmr.msra.gmra.mrb[4].mxu0 %v216_v16 }
 0x10f   :  { %502 = vmatmul.mubr.bf16.vlgmr.msra.gmra.mrb[4].mxu1 %v217_v18  ;;  %955 = vmatpush3.bf16.msra.mxu0 %v1059_v15 }
 0x110   :  { %977 = vmatpush3.bf16.msra.mxu1 %v1058_v17  ;;  %956 = vmatprep.subr.bf16.mxu0 %v1061_v3 }
 0x111   :  { %978 = vmatprep.subr.bf16.mxu1 %v1060_v19  ;;  %v855_v19 = vrot.slane %v1352_v58, %v854_v10 }
 0x113   :  { %957 = vmatpush3.bf16.msra.mxu0 %v1063_v20  ;;  %v860_v20 = vsub.s32 4, %v1218_v2 }
 0x114   :  { %979 = vmatpush3.bf16.msra.mxu1 %v1062_v21  ;;  %958 = vmatprep.subr.bf16.mxu0 %v1065_v22 }
 0x115   :  { %980 = vmatprep.subr.bf16.mxu1 %v1064_v23 }
 0x117   :  { %959 = vmatpush3.bf16.msra.mxu0 %v1067_v24  ;;  %v861_v24 = vrot.slane %v1352_v58, %v860_v20 }
 0x118   :  { %981 = vmatpush3.bf16.msra.mxu1 %v1066_v25  ;;  %960 = vmatprep.subr.bf16.mxu0 %v1069_v26 }
 0x119   :  { %982 = vmatprep.subr.bf16.mxu1 %v1068_v27 }
 0x11b   :  { %961 = vmatpush3.bf16.msra.mxu0 %v1071_v28  ;;  %v869_v28 = vsub.s32 5, %v1218_v2 }
 0x11c   :  { %983 = vmatpush3.bf16.msra.mxu1 %v1070_v29  ;;  %962 = vmatprep.subr.bf16.mxu0 %v1073_v30 }
 0x11d   :  { %984 = vmatprep.subr.bf16.mxu1 %v1072_v31  ;;  %v870_v29 = vrot.slane %v1352_v58, %v869_v28 }
 0x11f   :  { %963 = vmatpush3.bf16.msra.mxu0 %v1075_v32 }
 0x120   :  { %985 = vmatpush3.bf16.msra.mxu1 %v1074_v33  ;;  %964 = vmatprep.subr.bf16.mxu0 %v1077_v34 }
 0x121   :  { %986 = vmatprep.subr.bf16.mxu1 %v1076_v35 }
 0x123   :  { %965 = vmatpush3.bf16.msra.mxu0 %v1079_v36 }
 0x124   :  { %987 = vmatpush3.bf16.msra.mxu1 %v1078_v37  ;;  %966 = vmatprep.subr.bf16.mxu0 %v1081_v39 }
 0x125   :  { %988 = vmatprep.subr.bf16.mxu1 %v1080_v38 }
 0x127   :  { %967 = vmatpush3.bf16.msra.mxu0 %v1083_v41 }
 0x128   :  { %989 = vmatpush3.bf16.msra.mxu1 %v1082_v40  ;;  %968 = vmatprep.subr.bf16.mxu0 %v1085_v43 }
 0x129   :  { %990 = vmatprep.subr.bf16.mxu1 %v1084_v42 }
 0x12b   :  { %969 = vmatpush3.bf16.msra.mxu0 %v1087_v45 }
 0x12c   :  { %991 = vmatpush3.bf16.msra.mxu1 %v1086_v44 }
 0x1e1   :  { %v356_v51 = vpop.f32.mrb[4].mxu0 }
 0x1e2   :  { %v357_v52 = vadd.f32 %v356_v51, %v237_v47  ;;  %v358_v53 = vpop.f32.mrb[5].mxu0  ;;  %v503_v54 = vpop.f32.mrb[4].mxu1 }
 0x1e3   :  { %v359_v55 = vadd.f32 %v358_v53, %v241_v48  ;;  %v504_v56 = vadd.f32 %v503_v54, %v384_v49  ;;  %v360_v57 = vpop.f32.mrb[6].mxu0  ;;  %v505_v59 = vpop.f32.mrb[5].mxu1 }
 0x1e4   :  { %v363_v61 = vmax.f32 %v357_v52, 0.0  ;;  %v506_v62 = vadd.f32 %v505_v59, %v388_v50  ;;  %v361_v63 = vpop.f32.mrb[7].mxu0  ;;  %v507_v0 = vpop.f32.mrb[6].mxu1 }
 0x1e5   :  { %v364_v1 = vmax.f32 %v359_v55, 0.0  ;;  %v510_v5 = vmax.f32 %v504_v56, 0.0  ;;  %v508_v6 = vpop.f32.mrb[7].mxu1 }
 0x1e6   :  { %v511_v4 = vmax.f32 %v506_v62, 0.0  ;;  %v512_v8 = vpack.c.bf16 %v363_v61, %v363_v61 }
 0x1e7   :  { %v513_v7 = vpack.c.bf16 %v364_v1, %v364_v1  ;;  %v546_v60 = vpack.c.bf16 %v510_v5, %v510_v5 }
 0x1e8   :  { %v547_v9 = vpack.c.bf16 %v511_v4, %v511_v4 }
 0x1e9   :  { %844 = vmatprep.mubr.bf16.mxu1 %v513_v7 }
 0x1ea   :  { %708 = vmatprep.mubr.bf16.mxu0 %v547_v9  ;;  %845 = vmatmul.mubr.bf16.vlgmr.msra.gmra.mrb[8].mxu1 %v512_v8 }
 0x1eb   :  { %709 = vmatmul.mubr.bf16.vlgmr.msra.gmra.mrb[8].mxu0 %v546_v60 }
 0x2bd   :  { %v992_v11 = vpop.f32.mrb[8].mxu1 }
 0x2be   :  { %v970_v12 = vpop.f32.mrb[8].mxu0  ;;  %v993_v13 = vpop.f32.mrb[9].mxu1 }
 0x2bf   :  { %v994_v14 = vadd.f32 %v993_v13, %v992_v11  ;;  %v971_v15 = vpop.f32.mrb[9].mxu0  ;;  %v995_v16 = vpop.f32.mrb[10].mxu1 }
 0x2c0   :  { %v972_v17 = vadd.f32 %v971_v15, %v970_v12  ;;  %v973_v3 = vpop.f32.mrb[10].mxu0  ;;  %v996_v18 = vpop.f32.mrb[11].mxu1 }
 0x2c1   :  { %v974_v21 = vpop.f32.mrb[11].mxu0 }
 0x2c2   :  { %v847_v22 = vadd.f32 %v994_v14, %v972_v17 }
 0x2c4   :  { %v856_v23 = vadd.f32 %v855_v19, %v847_v22 }
 0x2c6   :  { %v857_v25 = vmax.f32 %v856_v23, 0.0 }
 0x2c8   :  { %v862_v26 = vmul.f32 %v861_v24, %v857_v25 }
 0x2ca   :  { %v864_v27 = vsel %vm863_vm3, %v862_v26, 0.0 }
 0x2cb   :  { %865 = vadd.xlane.f32.xlu0 %v864_v27 }
 0x358   :  { %v866_v30 = vpop.xlane.xlu0 %865 }
 0x359   :  { %v871_v31 = vadd.f32 %v870_v29, %v866_v30 }
 0x35b   :  { %873 = vst.msk [vmem:[%s1479_s10] sm:$0xff] %vm872_vm4, %v871_v31 }
 0x35c   :  { %878 = vsyncpa [#allocation3], 1 }
 0x35d   :  { %879 = vsyncpa [#allocation5], 1 }

</bundles_post_ra>
